<compile_context>
chip_gen: v7x
topology: tpu7x:2x2x1
jax: 0.10.0
libtpu: 0.0.40
codegen_flags: <defaults>
</compile_context>

<pallas_src>
import functools

import jax
import jax.numpy as jnp
from jax.experimental import pallas as pl
from jax.experimental.pallas import tpu as pltpu


SMOOTH = 1.0
DICE_WEIGHT = 0.5
CE_WEIGHT = 0.5

_LANES = 128
_VMEM_BUDGET_BYTES = 20 * 1024 * 1024   # per-step working-set target
_VMEM_LIMIT_BYTES = 48 * 1024 * 1024    # scoped-VMEM limit (< v7x 64 MiB physical)


def _rows_per_tile(C, total_rows, x_itemsize):
    """Spatial tile height (rows of 128 lanes), sized from C and the VMEM budget."""
    # Per spatial column: double-buffered logits block (2 * itemsize per class)
    # + ~8 f32 compiler temporaries per class (e/soft/onehot/ce/masks) + labels.
    per_col = C * (2 * x_itemsize + 8 * 4) + 2 * 4
    cols = max(_VMEM_BUDGET_BYTES // per_col, 8 * _LANES)
    rows = cols // _LANES
    if rows >= total_rows:
        return total_rows                      # single tile: any height is legal
    return max(8, (rows // 8) * 8)             # tiled: must be a sublane multiple


def _dice_ce_kernel(x_ref, t_ref, inter_ref, union_ref, ce_ref, *,
                    C, R, S, tiles_per_part):
    p = pl.program_id(0)                       # spatial partition (v7x megacore)
    s = pl.program_id(2)                       # spatial tile within partition

    @pl.when(s == 0)
    def _():
        inter_ref[...] = jnp.zeros_like(inter_ref)
        union_ref[...] = jnp.zeros_like(union_ref)
        ce_ref[...] = jnp.zeros_like(ce_ref)

    x = x_ref[0].astype(jnp.float32)           # (C, R, 128) logits, upcast in-kernel
    t = t_ref[0]                               # (1, R, 128) int32 labels

    # Validity mask from the global flat pixel index: handles the ragged last
    # tile / 128-alignment pad / out-of-range partition tiles without padding
    # the logits in HBM.
    g = p * tiles_per_part + s                 # global spatial-tile index
    base = g * (R * _LANES)
    row_ids = jax.lax.broadcasted_iota(jnp.int32, (1, R, _LANES), 1)
    lane_ids = jax.lax.broadcasted_iota(jnp.int32, (1, R, _LANES), 2)
    flat = base + row_ids * _LANES + lane_ids
    valid = flat < S                           # (1, R, 128) bool
    valid_f = valid.astype(jnp.float32)

    x = jnp.where(valid, x, 0.0)               # neutralize garbage / padded logits

    class_ids = jax.lax.broadcasted_iota(jnp.int32, (C, R, _LANES), 0)
    onehot = jnp.logical_and(class_ids == t, valid).astype(jnp.float32)

    # Softmax over the class axis: with the (C, rows, 128) layout this is pure
    # elementwise VPU work across C fully-packed vreg slabs.
    m = jnp.max(x, axis=0, keepdims=True)      # (1, R, 128)
    e = jnp.exp(x - m)                         # (C, R, 128)
    denom = jnp.sum(e, axis=0, keepdims=True)  # (1, R, 128)
    inv = valid_f / denom                      # hoisted, masked reciprocal
    soft = e * inv                             # zero on invalid columns
    lse = jnp.log(denom) + m                   # (1, R, 128)

    def _reduce(v):                            # (C, R, 128) -> (C, 1)
        return jnp.sum(jnp.sum(v, axis=1), axis=-1, keepdims=True)

    inter_step = _reduce(soft * onehot)
    union_step = _reduce(soft + onehot)        # soft & onehot are already masked
    ce_step = _reduce(onehot * (lse - x))      # per-class CE contributions

    # Tiny accumulation directly into the resident (1, 1, C, 1) output blocks.
    inter_ref[...] += inter_step.reshape(1, 1, C, 1)
    union_ref[...] += union_step.reshape(1, 1, C, 1)
    ce_ref[...] += ce_step.reshape(1, 1, C, 1)


def dice_ce_loss(inputs, targets, smooth=SMOOTH,
                 dice_weight=DICE_WEIGHT, ce_weight=CE_WEIGHT,
                 max_tile_rows=None):
    """inputs: (B, C, H, W) float logits (any float dtype); targets: (B, H, W) ints."""
    B, C, H, W = inputs.shape
    S = H * W

    x = inputs.reshape(B, C, S)                        # native dtype, no f32 copy
    t = targets.astype(jnp.int32).reshape(B, 1, S)

    # Sublane re-layout (contiguous => free): (B, C, S) -> (B, C, S/128, 128).
    total_rows = -(-S // _LANES)
    s128 = total_rows * _LANES
    if s128 != S:
        # TODO(synk): only a <=127-column alignment pad; still copies the
        # logits in HBM for non-128-aligned spatial sizes.
        x = jnp.pad(x, ((0, 0), (0, 0), (0, s128 - S)))
        t = jnp.pad(t, ((0, 0), (0, 0), (0, s128 - S)))
    x = x.reshape(B, C, total_rows, _LANES)
    t = t.reshape(B, 1, total_rows, _LANES)

    # C- / dtype-aware tile height.
    R = _rows_per_tile(C, total_rows, x.dtype.itemsize)
    if max_tile_rows is not None:
        R = min(R, max_tile_rows)
        if R < total_rows:
            R = max(8, (R // 8) * 8)
    nt = -(-total_rows // R)                           # spatial tiles per batch item

    # v7x megacore: if the batch axis alone can't feed two TensorCores, split
    # the spatial tiles across a leading parallel axis.
    P = 2 if (B == 1 and nt >= 2) else 1
    tiles_per_part = -(-nt // P)

    def in_map(p, b, s):
        # Clamp so an out-of-range partition tile re-reads a valid block;
        # the kernel masks it out via the flat-index validity test.
        return (b, 0, jnp.minimum(p * tiles_per_part + s, nt - 1), 0)

    def out_map(p, b, s):
        return (p, b, 0, 0)

    kernel = functools.partial(_dice_ce_kernel, C=C, R=R, S=S,
                               tiles_per_part=tiles_per_part)
    out_sds = jax.ShapeDtypeStruct((P, B, C, 1), jnp.float32)

    inter, union, ce = pl.pallas_call(
        kernel,
        out_shape=(out_sds, out_sds, out_sds),
        grid_spec=pltpu.PrefetchScalarGridSpec(
            num_scalar_prefetch=0,
            grid=(P, B, tiles_per_part),
            in_specs=[
                pl.BlockSpec((1, C, R, _LANES), in_map),
                pl.BlockSpec((1, 1, R, _LANES), in_map),
            ],
            out_specs=[
                pl.BlockSpec((1, 1, C, 1), out_map),
                pl.BlockSpec((1, 1, C, 1), out_map),
                pl.BlockSpec((1, 1, C, 1), out_map),
            ],
        ),
        compiler_params=pltpu.CompilerParams(
            dimension_semantics=("parallel", "parallel", "arbitrary"),
            vmem_limit_bytes=_VMEM_LIMIT_BYTES),
    )(x, t)

    # Tiny final combine in the wrapper (B*C values).
    inter = jnp.sum(inter, axis=0)[..., 0]             # (B, C)
    union = jnp.sum(union, axis=0)[..., 0]             # (B, C)
    ce_sum = jnp.sum(ce)                               # scalar

    dice = (2.0 * inter + smooth) / (union + smooth)
    dice_loss = 1.0 - jnp.mean(dice)
    ce_loss = ce_sum / jnp.float32(B * S)              # mean over real pixels only
    return dice_weight * dice_loss + ce_weight * ce_loss


def dice_ce_loss_ref(inputs, targets, smooth=SMOOTH,
                     dice_weight=DICE_WEIGHT, ce_weight=CE_WEIGHT):
    """Pure-JAX reference replicating the PyTorch module semantics."""
    B, C, H, W = inputs.shape
    x = inputs.astype(jnp.float32)
    t = targets.astype(jnp.int32)
    onehot = jax.nn.one_hot(t, C, dtype=jnp.float32).transpose(0, 3, 1, 2)
    soft = jax.nn.softmax(x, axis=1)
    soft_f = soft.reshape(B, C, -1)
    oh_f = onehot.reshape(B, C, -1)
    inter = (soft_f * oh_f).sum(-1)
    union = soft_f.sum(-1) + oh_f.sum(-1)
    dice = (2.0 * inter + smooth) / (union + smooth)
    dice_loss = 1.0 - dice.mean()
    logp = jax.nn.log_softmax(x, axis=1)
    ce_loss = -(onehot * logp).sum(1).mean()
    return dice_weight * dice_loss + ce_weight * ce_loss


if __name__ == "__main__":
    key = jax.random.PRNGKey(0)
    k1, k2 = jax.random.split(key)

    # Primary check: B=2, C=4, 16x16 (single spatial tile, batch-parallel grid).
    B, C, H, W = 2, 4, 16, 16
    inputs = jax.random.normal(k1, (B, C, H, W), dtype=jnp.float32)
    targets = jax.random.randint(k2, (B, H, W), 0, C, dtype=jnp.int32)
    loss = jax.block_until_ready(jax.jit(dice_ce_loss)(inputs, targets))
    ref = jax.block_until_ready(dice_ce_loss_ref(inputs, targets))
    assert jnp.allclose(loss, ref, rtol=1e-5, atol=1e-5), (loss, ref)

    # Secondary check: B=1 (exercises the spatial megacore split), non-128-
    # aligned spatial size (in-kernel validity mask), forced multi-tile
    # accumulation with a ragged / clamped last tile.
    k3, k4 = jax.random.split(k2)
    B2, C2, H2, W2 = 1, 3, 48, 50
    inputs2 = jax.random.normal(k3, (B2, C2, H2, W2), dtype=jnp.float32)
    targets2 = jax.random.randint(k4, (B2, H2, W2), 0, C2, dtype=jnp.int32)
    loss2 = jax.block_until_ready(dice_ce_loss(inputs2, targets2, max_tile_rows=8))
    ref2 = jax.block_until_ready(dice_ce_loss_ref(inputs2, targets2))
    assert jnp.allclose(loss2, ref2, rtol=1e-5, atol=1e-5), (loss2, ref2)

    print("KERNEL_OK")
</pallas_src>

<mosaic_0001>
module attributes {stable_mosaic.version = 11 : i64} {
  func.func @_dice_ce_kernel(%arg0: i32, %arg1: i32, %arg2: i32, %arg3: memref<1x4x2x128xf32, #tpu.memory_space<vmem>>, %arg4: memref<1x1x2x128xi32, #tpu.memory_space<vmem>>, %arg5: memref<1x1x4x1xf32, #tpu.memory_space<vmem>>, %arg6: memref<1x1x4x1xf32, #tpu.memory_space<vmem>>, %arg7: memref<1x1x4x1xf32, #tpu.memory_space<vmem>>) attributes {dimension_semantics = [#tpu.dimension_semantics<parallel>, #tpu.dimension_semantics<parallel>, #tpu.dimension_semantics<arbitrary>], iteration_bounds = array<i64: 1, 2, 1>, scalar_prefetch = 0 : i64, scratch_operands = 0 : i64, tpu.core_type = #tpu.core_type<tc>, window_params = [{transform_indices = @transform_0, window_bounds = array<i64: 1, 4, 2, 128>}, {transform_indices = @transform_1, window_bounds = array<i64: 1, 1, 2, 128>}, {transform_indices = @transform_2, window_bounds = array<i64: 1, 1, 4, 1>}, {transform_indices = @transform_3, window_bounds = array<i64: 1, 1, 4, 1>}, {transform_indices = @transform_4, window_bounds = array<i64: 1, 1, 4, 1>}]} {
    %c0_i32 = arith.constant 0 : i32
    %0 = arith.cmpi eq, %arg2, %c0_i32 : i32
    %1 = arith.extui %0 : i1 to i32
    %c0_i32_0 = arith.constant 0 : i32
    %2 = arith.cmpi ne, %1, %c0_i32_0 : i32
    scf.if %2 {
      %cst_41 = arith.constant 0.000000e+00 : f32
      %70 = vector.broadcast %cst_41 : f32 to vector<1x1x4x1xf32>
      %c0_42 = arith.constant 0 : index
      %c0_43 = arith.constant 0 : index
      %c0_44 = arith.constant 0 : index
      %c0_45 = arith.constant 0 : index
      %71 = vector.load %arg5[%c0_42, %c0_43, %c0_44, %c0_45] : memref<1x1x4x1xf32, #tpu.memory_space<vmem>>, vector<1x1x4x1xf32>
      tpu.vector_store %arg5[%c0_42, %c0_43, %c0_44, %c0_45], %70 {strides = array<i32>} : memref<1x1x4x1xf32, #tpu.memory_space<vmem>>, vector<1x1x4x1xf32>,
      %cst_46 = arith.constant 0.000000e+00 : f32
      %72 = vector.broadcast %cst_46 : f32 to vector<1x1x4x1xf32>
      %c0_47 = arith.constant 0 : index
      %c0_48 = arith.constant 0 : index
      %c0_49 = arith.constant 0 : index
      %c0_50 = arith.constant 0 : index
      %73 = vector.load %arg6[%c0_47, %c0_48, %c0_49, %c0_50] : memref<1x1x4x1xf32, #tpu.memory_space<vmem>>, vector<1x1x4x1xf32>
      tpu.vector_store %arg6[%c0_47, %c0_48, %c0_49, %c0_50], %72 {strides = array<i32>} : memref<1x1x4x1xf32, #tpu.memory_space<vmem>>, vector<1x1x4x1xf32>,
      %cst_51 = arith.constant 0.000000e+00 : f32
      %74 = vector.broadcast %cst_51 : f32 to vector<1x1x4x1xf32>
      %c0_52 = arith.constant 0 : index
      %c0_53 = arith.constant 0 : index
      %c0_54 = arith.constant 0 : index
      %c0_55 = arith.constant 0 : index
      %75 = vector.load %arg7[%c0_52, %c0_53, %c0_54, %c0_55] : memref<1x1x4x1xf32, #tpu.memory_space<vmem>>, vector<1x1x4x1xf32>
      tpu.vector_store %arg7[%c0_52, %c0_53, %c0_54, %c0_55], %74 {strides = array<i32>} : memref<1x1x4x1xf32, #tpu.memory_space<vmem>>, vector<1x1x4x1xf32>,
    } else {
    }
    %c0 = arith.constant 0 : index
    %c0_1 = arith.constant 0 : index
    %c0_2 = arith.constant 0 : index
    %c0_3 = arith.constant 0 : index
    %3 = vector.load %arg3[%c0, %c0_1, %c0_2, %c0_3] : memref<1x4x2x128xf32, #tpu.memory_space<vmem>>, vector<1x4x2x128xf32>
    %4 = vector.shape_cast %3 : vector<1x4x2x128xf32> to vector<4x2x128xf32>
    %c0_4 = arith.constant 0 : index
    %c0_5 = arith.constant 0 : index
    %c0_6 = arith.constant 0 : index
    %c0_7 = arith.constant 0 : index
    %5 = vector.load %arg4[%c0_4, %c0_5, %c0_6, %c0_7] : memref<1x1x2x128xi32, #tpu.memory_space<vmem>>, vector<1x1x2x128xi32>
    %6 = vector.shape_cast %5 : vector<1x1x2x128xi32> to vector<1x2x128xi32>
    %c1_i32 = arith.constant 1 : i32
    %7 = arith.muli %arg0, %c1_i32 : i32
    %8 = arith.addi %7, %arg2 : i32
    %c256_i32 = arith.constant 256 : i32
    %9 = arith.muli %8, %c256_i32 : i32
    %10 = tpu.iota {dimensions = array<i32: 1>} : vector<1x2x128xi32>
    %11 = tpu.iota {dimensions = array<i32: 2>} : vector<1x2x128xi32>
    %c128_i32 = arith.constant 128 : i32
    %12 = vector.broadcast %c128_i32 : i32 to vector<1x2x128xi32>
    %13 = arith.muli %10, %12 : vector<1x2x128xi32>
    %14 = vector.broadcast %9 : i32 to vector<1x2x128xi32>
    %15 = arith.addi %14, %13 : vector<1x2x128xi32>
    %16 = arith.addi %15, %11 : vector<1x2x128xi32>
    %c256_i32_8 = arith.constant 256 : i32
    %17 = vector.broadcast %c256_i32_8 : i32 to vector<1x2x128xi32>
    %18 = arith.cmpi slt, %16, %17 : vector<1x2x128xi32>
    %19 = arith.extui %18 : vector<1x2x128xi1> to vector<1x2x128xi32>
    %20 = arith.sitofp %19 : vector<1x2x128xi32> to vector<1x2x128xf32>
    %cst = arith.constant 0.000000e+00 : f32
    %21 = vector.shape_cast %18 : vector<1x2x128xi1> to vector<1x2x128xi1>
    %22 = vector.broadcast %21 : vector<1x2x128xi1> to vector<4x2x128xi1>
    %23 = vector.broadcast %cst : f32 to vector<4x2x128xf32>
    %24 = arith.select %22, %4, %23 : vector<4x2x128xi1>, vector<4x2x128xf32>
    %25 = tpu.iota {dimensions = array<i32: 0>} : vector<4x2x128xi32>
    %26 = vector.broadcast %6 : vector<1x2x128xi32> to vector<4x2x128xi32>
    %27 = arith.cmpi eq, %25, %26 : vector<4x2x128xi32>
    %28 = vector.broadcast %18 : vector<1x2x128xi1> to vector<4x2x128xi1>
    %29 = arith.andi %27, %28 : vector<4x2x128xi1>
    %30 = arith.extui %29 : vector<4x2x128xi1> to vector<4x2x128xi32>
    %31 = arith.sitofp %30 : vector<4x2x128xi32> to vector<4x2x128xf32>
    %cst_9 = arith.constant dense<0xFF800000> : vector<2x128xf32>
    %32 = vector.multi_reduction <maximumf>, %24, %cst_9 [0] : vector<4x2x128xf32> to vector<2x128xf32>
    %33 = vector.shape_cast %32 : vector<2x128xf32> to vector<1x2x128xf32>
    %34 = vector.broadcast %33 : vector<1x2x128xf32> to vector<4x2x128xf32>
    %35 = arith.subf %24, %34 : vector<4x2x128xf32>
    %36 = math.exp %35 : vector<4x2x128xf32>
    %cst_10 = arith.constant dense<0.000000e+00> : vector<2x128xf32>
    %37 = vector.multi_reduction <add>, %36, %cst_10 [0] : vector<4x2x128xf32> to vector<2x128xf32>
    %38 = vector.shape_cast %37 : vector<2x128xf32> to vector<1x2x128xf32>
    %39 = arith.divf %20, %38 : vector<1x2x128xf32>
    %40 = vector.broadcast %39 : vector<1x2x128xf32> to vector<4x2x128xf32>
    %41 = arith.mulf %36, %40 : vector<4x2x128xf32>
    %42 = math.log %38 : vector<1x2x128xf32>
    %43 = arith.addf %42, %33 : vector<1x2x128xf32>
    %44 = arith.mulf %41, %31 : vector<4x2x128xf32>
    %cst_11 = arith.constant dense<0.000000e+00> : vector<4x128xf32>
    %45 = vector.multi_reduction <add>, %44, %cst_11 [1] : vector<4x2x128xf32> to vector<4x128xf32>
    %cst_12 = arith.constant dense<0.000000e+00> : vector<4xf32>
    %46 = vector.multi_reduction <add>, %45, %cst_12 [1] : vector<4x128xf32> to vector<4xf32>
    %47 = vector.shape_cast %46 : vector<4xf32> to vector<4x1xf32>
    %48 = arith.addf %41, %31 : vector<4x2x128xf32>
    %cst_13 = arith.constant dense<0.000000e+00> : vector<4x128xf32>
    %49 = vector.multi_reduction <add>, %48, %cst_13 [1] : vector<4x2x128xf32> to vector<4x128xf32>
    %cst_14 = arith.constant dense<0.000000e+00> : vector<4xf32>
    %50 = vector.multi_reduction <add>, %49, %cst_14 [1] : vector<4x128xf32> to vector<4xf32>
    %51 = vector.shape_cast %50 : vector<4xf32> to vector<4x1xf32>
    %52 = vector.broadcast %43 : vector<1x2x128xf32> to vector<4x2x128xf32>
    %53 = arith.subf %52, %24 : vector<4x2x128xf32>
    %54 = arith.mulf %31, %53 : vector<4x2x128xf32>
    %cst_15 = arith.constant dense<0.000000e+00> : vector<4x128xf32>
    %55 = vector.multi_reduction <add>, %54, %cst_15 [1] : vector<4x2x128xf32> to vector<4x128xf32>
    %cst_16 = arith.constant dense<0.000000e+00> : vector<4xf32>
    %56 = vector.multi_reduction <add>, %55, %cst_16 [1] : vector<4x128xf32> to vector<4xf32>
    %57 = vector.shape_cast %56 : vector<4xf32> to vector<4x1xf32>
    %c0_17 = arith.constant 0 : index
    %c0_18 = arith.constant 0 : index
    %c0_19 = arith.constant 0 : index
    %c0_20 = arith.constant 0 : index
    %58 = vector.load %arg5[%c0_17, %c0_18, %c0_19, %c0_20] : memref<1x1x4x1xf32, #tpu.memory_space<vmem>>, vector<1x1x4x1xf32>
    %59 = vector.shape_cast %47 : vector<4x1xf32> to vector<1x1x4x1xf32>
    %60 = arith.addf %58, %59 : vector<1x1x4x1xf32>
    %c0_21 = arith.constant 0 : index
    %c0_22 = arith.constant 0 : index
    %c0_23 = arith.constant 0 : index
    %c0_24 = arith.constant 0 : index
    %61 = vector.load %arg5[%c0_21, %c0_22, %c0_23, %c0_24] : memref<1x1x4x1xf32, #tpu.memory_space<vmem>>, vector<1x1x4x1xf32>
    tpu.vector_store %arg5[%c0_21, %c0_22, %c0_23, %c0_24], %60 {strides = array<i32>} : memref<1x1x4x1xf32, #tpu.memory_space<vmem>>, vector<1x1x4x1xf32>,
    %c0_25 = arith.constant 0 : index
    %c0_26 = arith.constant 0 : index
    %c0_27 = arith.constant 0 : index
    %c0_28 = arith.constant 0 : index
    %62 = vector.load %arg6[%c0_25, %c0_26, %c0_27, %c0_28] : memref<1x1x4x1xf32, #tpu.memory_space<vmem>>, vector<1x1x4x1xf32>
    %63 = vector.shape_cast %51 : vector<4x1xf32> to vector<1x1x4x1xf32>
    %64 = arith.addf %62, %63 : vector<1x1x4x1xf32>
    %c0_29 = arith.constant 0 : index
    %c0_30 = arith.constant 0 : index
    %c0_31 = arith.constant 0 : index
    %c0_32 = arith.constant 0 : index
    %65 = vector.load %arg6[%c0_29, %c0_30, %c0_31, %c0_32] : memref<1x1x4x1xf32, #tpu.memory_space<vmem>>, vector<1x1x4x1xf32>
    tpu.vector_store %arg6[%c0_29, %c0_30, %c0_31, %c0_32], %64 {strides = array<i32>} : memref<1x1x4x1xf32, #tpu.memory_space<vmem>>, vector<1x1x4x1xf32>,
    %c0_33 = arith.constant 0 : index
    %c0_34 = arith.constant 0 : index
    %c0_35 = arith.constant 0 : index
    %c0_36 = arith.constant 0 : index
    %66 = vector.load %arg7[%c0_33, %c0_34, %c0_35, %c0_36] : memref<1x1x4x1xf32, #tpu.memory_space<vmem>>, vector<1x1x4x1xf32>
    %67 = vector.shape_cast %57 : vector<4x1xf32> to vector<1x1x4x1xf32>
    %68 = arith.addf %66, %67 : vector<1x1x4x1xf32>
    %c0_37 = arith.constant 0 : index
    %c0_38 = arith.constant 0 : index
    %c0_39 = arith.constant 0 : index
    %c0_40 = arith.constant 0 : index
    %69 = vector.load %arg7[%c0_37, %c0_38, %c0_39, %c0_40] : memref<1x1x4x1xf32, #tpu.memory_space<vmem>>, vector<1x1x4x1xf32>
    tpu.vector_store %arg7[%c0_37, %c0_38, %c0_39, %c0_40], %68 {strides = array<i32>} : memref<1x1x4x1xf32, #tpu.memory_space<vmem>>, vector<1x1x4x1xf32>,
    return
  }
  func.func @transform_0(%arg0: i32, %arg1: i32, %arg2: i32) -> (i32, i32, i32, i32) {
    %c1_i32 = arith.constant 1 : i32
    %0 = arith.muli %arg0, %c1_i32 : i32
    %1 = arith.addi %0, %arg2 : i32
    %c0_i32 = arith.constant 0 : i32
    %2 = arith.minsi %1, %c0_i32 : i32
    %c0_i32_0 = arith.constant 0 : i32
    %c0_i32_1 = arith.constant 0 : i32
    %c0_i32_2 = arith.constant 0 : i32
    return %arg1, %c0_i32_0, %2, %c0_i32_1 : i32, i32, i32, i32
  }
  func.func @transform_1(%arg0: i32, %arg1: i32, %arg2: i32) -> (i32, i32, i32, i32) {
    %c1_i32 = arith.constant 1 : i32
    %0 = arith.muli %arg0, %c1_i32 : i32
    %1 = arith.addi %0, %arg2 : i32
    %c0_i32 = arith.constant 0 : i32
    %2 = arith.minsi %1, %c0_i32 : i32
    %c0_i32_0 = arith.constant 0 : i32
    %c0_i32_1 = arith.constant 0 : i32
    %c0_i32_2 = arith.constant 0 : i32
    return %arg1, %c0_i32_0, %2, %c0_i32_1 : i32, i32, i32, i32
  }
  func.func @transform_2(%arg0: i32, %arg1: i32, %arg2: i32) -> (i32, i32, i32, i32) {
    %c0_i32 = arith.constant 0 : i32
    %c0_i32_0 = arith.constant 0 : i32
    %c0_i32_1 = arith.constant 0 : i32
    return %arg0, %arg1, %c0_i32, %c0_i32_0 : i32, i32, i32, i32
  }
  func.func @transform_3(%arg0: i32, %arg1: i32, %arg2: i32) -> (i32, i32, i32, i32) {
    %c0_i32 = arith.constant 0 : i32
    %c0_i32_0 = arith.constant 0 : i32
    %c0_i32_1 = arith.constant 0 : i32
    return %arg0, %arg1, %c0_i32, %c0_i32_0 : i32, i32, i32, i32
  }
  func.func @transform_4(%arg0: i32, %arg1: i32, %arg2: i32) -> (i32, i32, i32, i32) {
    %c0_i32 = arith.constant 0 : i32
    %c0_i32_0 = arith.constant 0 : i32
    %c0_i32_1 = arith.constant 0 : i32
    return %arg0, %arg1, %c0_i32, %c0_i32_0 : i32, i32, i32, i32
  }
}

</mosaic_0001>

<bundles_post_ra>
// kernel: dice_ce_loss.1
= control target key start
LH: loop header
LB: loop body
LE: loop exit
PB: predicated region body
PF: predicated region fallthrough
CT: control target
= control target key end

     0   :  { %s878_s15 = smov 0   ;;  %s880_s16 = smov 0   ;;  %s1046_s0 = inlined_call_operand.vmem [shape: f32[2,4,2,128], index: 0, kind: input, shape index: {}]   ;;  %s1047_s1 = inlined_call_operand.vmem [shape: s32[2,1,2,128], index: 1, kind: input, shape index: {}]   ;;  %s1048_s2 = inlined_call_operand.vmem [shape: f32[1,2,4,1], index: 2, kind: output, shape index: {0}]   ;;  %s1049_s3 = inlined_call_operand.vmem [shape: f32[1,2,4,1], index: 3, kind: output, shape index: {1}]   ;;  %s1050_s4 = inlined_call_operand.vmem [shape: f32[1,2,4,1], index: 4, kind: output, shape index: {2}]  }
   0x1   :  { %s882_s17 = smov 0  }
   0x2 LB: > { %s30_s18 = sadd.s32 1, %s846_s16  ;;  %p776_p0 = scmp.ge.s32.totalorder %s850_s17, 1  ;;  %s850_s17 = sphi %s882_s17, %s15_s17   ;;  %s846_s16 = sphi %s880_s16, %s1052_s16   ;;  %s842_s15 = sphi %s878_s15, %s1051_s15  }
   0x3   : > { %p32_p1 = scmp.ge.s32.totalorder %s30_s18, 2  ;;  %p235_p2 = scmp.lt.s32.totalorder %s850_s17, 3 }
   0x5   : > { %s1054_s18 = smov (%p32_p1, %s30_s18), 0  ;;  %p236_p3 = pnand %p776_p0, %p235_p2 }
   0x6   : > { %p299_p4 = scmp.lt.s32.totalorder (!%p236_p3), %s842_s15, 1  ;;  %v362_v0 = vlaneseq (!%p236_p3)  ;;  %vm351_vm0 = vcmask (!%p236_p3), 3072   ;;  %vm394_vm1 = vcmask (!%p236_p3), 1041408   ;;  %v852_v12 = vmov (!%p236_p3), 0.0  }
   0x7   : > { %239 = sbr.rel (%p236_p3) target bundleno = 244 (0xf4), region = 28  ;;  %vm466_vm11 = vcmask (!%p236_p3), 1041409   ;;  %vm468_vm12 = vcmask (!%p236_p3), 1042434   ;;  %vm470_vm13 = vcmask (!%p236_p3), 1043459   ;;  %vm473_vm14 = vcmask (!%p236_p3), 1043456  }
   0x8   : > { %v363_v1 = vshrl.u32 (!%p236_p3), %v362_v0, 7  ;;  %v365_v2 = vand.u32 (!%p236_p3), 127, %v362_v0 }
   0xa   : > { %v366_v3 = vmul.u32 (!%p236_p3), 128, %v363_v1 }
   0xc   : > { %v369_v7 = vadd.s32 (!%p236_p3), %v366_v3, %v365_v2 }
   0xe   : > { %s1056_s15 = smov (!%p299_p4, %s842_s15), 1  ;;  %vm370_vm2 = vcmp.lt.s32.totalorder %v369_v7, 256 }
   0xf   : > { %s790_s19 = sshll.u32 %s1056_s15, 3  ;;  %s903_s23 = sshll.u32 %s1056_s15, 2  ;;  %v783_v41 = vsel %vm370_vm2, 1.0, %v852_v12 }
  0x10   : > { %s306_s22 = scalar_lea.vmem %s1046_s0, %s790_s19  ;;  %s909_s26 = scalar_lea.vmem %s1048_s2, %s903_s23 }
  0x11   : > { %v355_v4 = vld [vmem:[%s306_s22] sm:$0x3]  ;;  %v356_v5 = vld [vmem:[%s306_s22 + $0x2] sm:$0x3]  ;;  %v357_v6 = vld [vmem:[%s306_s22 + $0x4] sm:$0x3]  ;;  %s346_s7 = scalar_lea.vmem %s1050_s4, %s903_s23  ;;  %s338_s10 = scalar_lea.vmem %s1049_s3, %s903_s23 }
  0x12   : > { %v358_v8 = vld [vmem:[%s306_s22 + $0x6] sm:$0x3]  ;;  %v912_v9 = vsel %vm370_vm2, %v355_v4, 0.0  ;;  %v915_v10 = vsel %vm370_vm2, %v356_v5, 0.0  ;;  %v918_v11 = vsel %vm370_vm2, %v357_v6, 0.0  ;;  %s779_s27 = sshll.u32 %s1056_s15, 1 }
  0x13   : > { %352 = vst.msk [vmem:[%s909_s26] sm:$0xf] %vm351_vm0, %v852_v12  ;;  %v924_v13 = vsel %vm370_vm2, %v358_v8, 0.0  ;;  %v395_v14 = vsel %vm394_vm1, %v912_v9, -inf  ;;  %v396_v15 = vsel %vm394_vm1, %v915_v10, -inf  ;;  %v397_v16 = vsel %vm394_vm1, %v918_v11, -inf  ;;  %s319_s30 = scalar_lea.vmem %s1047_s1, %s779_s27 }
  0x14   : > { %v398_v17 = vsel %vm394_vm1, %v924_v13, -inf  ;;  %v399_v18 = vmax.f32 %v395_v14, %v396_v15  ;;  %v359_v40 = vld [vmem:[%s319_s30] sm:$0x3]  ;;  %354 = vst.msk [vmem:[%s346_s7] sm:$0xf] %vm351_vm0, %v852_v12 }
  0x15   : > { %v400_v19 = vmax.f32 %v397_v16, %v398_v17  ;;  %vm378_vm3 = vcmp.eq.s32.totalorder %v359_v40, 0  ;;  %vm379_vm4 = vcmp.eq.s32.totalorder %v359_v40, 1  ;;  %vm380_vm5 = vcmp.eq.s32.totalorder %v359_v40, 2  ;;  %353 = vst.msk [vmem:[%s338_s10] sm:$0xf] %vm351_vm0, %v852_v12 }
  0x16   : > { %vm381_vm6 = vcmp.eq.s32.totalorder %v359_v40, 3  ;;  %vm382_vm7 = vmand %vm378_vm3, %vm370_vm2 }
  0x17   : > { %v401_v20 = vmax.f32 %v399_v18, %v400_v19  ;;  %vm383_vm8 = vmand %vm379_vm4, %vm370_vm2  ;;  %v953_v44 = vsel %vm382_vm7, 1.0, %v852_v12 }
  0x18   : > { %vm384_vm9 = vmand %vm380_vm5, %vm370_vm2  ;;  %v956_v46 = vsel %vm383_vm8, 1.0, %v852_v12 }
  0x19   : > { %v402_v21 = vsub.f32 %v912_v9, %v401_v20  ;;  %v403_v22 = vsub.f32 %v915_v10, %v401_v20  ;;  %v404_v23 = vsub.f32 %v918_v11, %v401_v20  ;;  %v405_v24 = vsub.f32 %v924_v13, %v401_v20  ;;  %vm385_vm10 = vmand %vm381_vm6, %vm370_vm2 }
  0x1a   : > { %v959_v47 = vsel %vm384_vm9, 1.0, %v852_v12  ;;  %v962_v48 = vsel %vm385_vm10, 1.0, %v852_v12 }
  0x1b   : > { %v406_v25 = vmul.f32 1.442695, %v402_v21  ;;  %v408_v26 = vmul.f32 1.442695, %v403_v22  ;;  %v410_v27 = vmul.f32 1.442695, %v404_v23 }
  0x1c   : > { %v412_v28 = vmul.f32 1.442695, %v405_v24 }
  0x1d   : > { %816 = vpow2.f32 %v406_v25 }
  0x1e   : > { %818 = vpow2.f32 %v408_v26 }
  0x1f   : > { %820 = vpow2.f32 %v410_v27 }
  0x20   : > { %822 = vpow2.f32 %v412_v28 }
  0x27   : > { %v817_v29 = vpop.eup %816 }
  0x28   : > { %v819_v30 = vpop.eup %818  ;;  %v414_v31 = vsel %vm394_vm1, %v817_v29, 0.0 }
  0x29   : > { %v821_v32 = vpop.eup %820  ;;  %v415_v33 = vsel %vm394_vm1, %v819_v30, 0.0 }
  0x2a   : > { %v823_v34 = vpop.eup %822  ;;  %v416_v35 = vadd.f32 %v415_v33, %v414_v31  ;;  %v417_v36 = vsel %vm394_vm1, %v821_v32, 0.0 }
  0x2b   : > { %v419_v37 = vsel %vm394_vm1, %v823_v34, 0.0 }
  0x2c   : > { %v418_v38 = vadd.f32 %v417_v36, %v416_v35 }
  0x2e   : > { %v420_v39 = vadd.f32 %v419_v37, %v418_v38 }
  0x30   : > { %824 = vrcp.f32 %v420_v39 }
  0x31   : > { %826 = vlog2.f32 %v420_v39 }
  0x3a   : > { %v825_v42 = vpop.eup %824 }
  0x3b   : > { %v827_v43 = vpop.eup %826  ;;  %v422_v45 = vmul.f32 %v825_v42, %v783_v41 }
  0x3c   : > { %v428_v49 = vmul.f32 0.6931472, %v827_v43 }
  0x3d   : > { %v964_v50 = vmul.f32 %v817_v29, %v422_v45  ;;  %v966_v51 = vmul.f32 %v819_v30, %v422_v45  ;;  %v968_v52 = vmul.f32 %v821_v32, %v422_v45  ;;  %v970_v53 = vmul.f32 %v823_v34, %v422_v45 }
  0x3e   : > { %v429_v54 = vadd.f32 %v428_v49, %v401_v20 }
  0x3f   : > { %v430_v55 = vmul.f32 %v953_v44, %v964_v50  ;;  %v431_v56 = vmul.f32 %v956_v46, %v966_v51  ;;  %v432_v57 = vmul.f32 %v959_v47, %v968_v52  ;;  %v433_v58 = vmul.f32 %v962_v48, %v970_v53 }
  0x40   : > { %v520_v59 = vsub.f32 %v429_v54, %v912_v9  ;;  %v521_v60 = vsub.f32 %v429_v54, %v915_v10  ;;  %v522_v61 = vsub.f32 %v429_v54, %v918_v11  ;;  %v523_v62 = vsub.f32 %v429_v54, %v924_v13 }
  0x41   : > { %v434_v63 = vsel %vm394_vm1, %v430_v55, 0.0  ;;  %v441_v0 = vsel %vm394_vm1, %v431_v56, 0.0  ;;  %v448_v1 = vsel %vm394_vm1, %v432_v57, 0.0  ;;  %v455_v2 = vsel %vm394_vm1, %v433_v58, 0.0 }
  0x42   : > { %v435_v3 = vrot.slane %v434_v63, 4  ;;  %v442_v4 = vrot.slane %v441_v0, 4  ;;  %v449_v5 = vrot.slane %v448_v1, 4  ;;  %v456_v6 = vrot.slane %v455_v2, 4 }
  0x43   : > { %v524_v7 = vmul.f32 %v953_v44, %v520_v59  ;;  %v525_v8 = vmul.f32 %v956_v46, %v521_v60  ;;  %v526_v9 = vmul.f32 %v959_v47, %v522_v61  ;;  %v527_v10 = vmul.f32 %v962_v48, %v523_v62 }
  0x44   : > { %v436_v11 = vadd.f32 %v435_v3, %v434_v63  ;;  %v443_v13 = vadd.f32 %v442_v4, %v441_v0  ;;  %v450_v14 = vadd.f32 %v449_v5, %v448_v1  ;;  %v457_v15 = vadd.f32 %v456_v6, %v455_v2 }
  0x45   : > { %v528_v16 = vsel %vm394_vm1, %v524_v7, 0.0  ;;  %v535_v17 = vsel %vm394_vm1, %v525_v8, 0.0  ;;  %v542_v18 = vsel %vm394_vm1, %v526_v9, 0.0  ;;  %v549_v19 = vsel %vm394_vm1, %v527_v10, 0.0 }
  0x46   : > { %v437_v20 = vrot.slane %v436_v11, 2  ;;  %v444_v21 = vrot.slane %v443_v13, 2  ;;  %v451_v22 = vrot.slane %v450_v14, 2  ;;  %v458_v23 = vrot.slane %v457_v15, 2 }
  0x47   : > { %v529_v24 = vrot.slane %v528_v16, 4  ;;  %v536_v25 = vrot.slane %v535_v17, 4  ;;  %v543_v26 = vrot.slane %v542_v18, 4  ;;  %v550_v27 = vrot.slane %v549_v19, 4 }
  0x48   : > { %v438_v28 = vadd.f32 %v437_v20, %v436_v11  ;;  %v445_v29 = vadd.f32 %v444_v21, %v443_v13  ;;  %v452_v30 = vadd.f32 %v451_v22, %v450_v14  ;;  %v459_v31 = vadd.f32 %v458_v23, %v457_v15 }
  0x49   : > { %v530_v32 = vadd.f32 %v529_v24, %v528_v16  ;;  %v537_v33 = vadd.f32 %v536_v25, %v535_v17  ;;  %v544_v34 = vadd.f32 %v543_v26, %v542_v18  ;;  %v551_v35 = vadd.f32 %v550_v27, %v549_v19 }
  0x4a   : > { %v439_v36 = vrot.slane %v438_v28, 1  ;;  %v446_v37 = vrot.slane %v445_v29, 1  ;;  %v453_v38 = vrot.slane %v452_v30, 1  ;;  %v460_v39 = vrot.slane %v459_v31, 1 }
  0x4b   : > { %v531_v40 = vrot.slane %v530_v32, 2  ;;  %v538_v41 = vrot.slane %v537_v33, 2  ;;  %v545_v42 = vrot.slane %v544_v34, 2  ;;  %v552_v43 = vrot.slane %v551_v35, 2 }
  0x4c   : > { %v440_v45 = vadd.f32 %v439_v36, %v438_v28  ;;  %v447_v49 = vadd.f32 %v446_v37, %v445_v29  ;;  %v454_v54 = vadd.f32 %v453_v38, %v452_v30  ;;  %v461_v55 = vadd.f32 %v460_v39, %v459_v31 }
  0x4d   : > { %v532_v56 = vadd.f32 %v531_v40, %v530_v32  ;;  %v539_v57 = vadd.f32 %v538_v41, %v537_v33  ;;  %v546_v58 = vadd.f32 %v545_v42, %v544_v34  ;;  %v553_v59 = vadd.f32 %v552_v43, %v551_v35  ;;  %v567_v41 = vld [vmem:[%s909_s26] sm:$0xf] }
  0x4e   : > { %v467_v60 = vsel %vm466_vm11, %v447_v49, %v440_v45  ;;  %v477_v61 = vadd.f32 %v953_v44, %v964_v50  ;;  %v478_v62 = vadd.f32 %v956_v46, %v966_v51  ;;  %v479_v63 = vadd.f32 %v959_v47, %v968_v52  ;;  %v574_v45 = vld [vmem:[%s346_s7] sm:$0xf] }
  0x4f   : > { %v469_v0 = vsel %vm468_vm12, %v454_v54, %v467_v60  ;;  %v533_v1 = vrot.slane %v532_v56, 1  ;;  %v540_v2 = vrot.slane %v539_v57, 1  ;;  %v547_v3 = vrot.slane %v546_v58, 1 }
  0x50   : > { %v471_v4 = vsel %vm470_vm13, %v461_v55, %v469_v0  ;;  %v554_v5 = vrot.slane %v553_v59, 1  ;;  %v480_v6 = vadd.f32 %v962_v48, %v970_v53  ;;  %v481_v7 = vsel %vm394_vm1, %v477_v61, 0.0  ;;  %v571_v55 = vld [vmem:[%s338_s10] sm:$0xf] }
  0x51   : > { %v474_v44 = vsel %vm473_vm14, %v471_v4, 0.0  ;;  %v534_v50 = vadd.f32 %v533_v1, %v532_v56  ;;  %v541_v46 = vadd.f32 %v540_v2, %v539_v57  ;;  %v548_v51 = vadd.f32 %v547_v3, %v546_v58 }
  0x52   : > { %475 = vadd.xlane.f32.xlu0 %v474_v44  ;;  %v555_v47 = vadd.f32 %v554_v5, %v553_v59  ;;  %v482_v52 = vrot.slane %v481_v7, 4  ;;  %v488_v8 = vsel %vm394_vm1, %v478_v62, 0.0  ;;  %v495_v9 = vsel %vm394_vm1, %v479_v63, 0.0 }
  0x53   : > { %v560_v10 = vsel %vm466_vm11, %v541_v46, %v534_v50  ;;  %v489_v11 = vrot.slane %v488_v8, 4  ;;  %v496_v13 = vrot.slane %v495_v9, 4  ;;  %v502_v48 = vsel %vm394_vm1, %v480_v6, 0.0 }
  0x54   : > { %v561_v53 = vsel %vm468_vm12, %v548_v51, %v560_v10  ;;  %v483_v14 = vadd.f32 %v482_v52, %v481_v7  ;;  %v503_v15 = vrot.slane %v502_v48, 4 }
  0x55   : > { %v562_v16 = vsel %vm470_vm13, %v555_v47, %v561_v53  ;;  %v490_v17 = vadd.f32 %v489_v11, %v488_v8  ;;  %v497_v18 = vadd.f32 %v496_v13, %v495_v9 }
  0x56   : > { %v564_v19 = vsel %vm473_vm14, %v562_v16, 0.0  ;;  %v484_v20 = vrot.slane %v483_v14, 2  ;;  %v504_v21 = vadd.f32 %v503_v15, %v502_v48 }
  0x57   : > { %565 = vadd.xlane.f32.xlu1 %v564_v19  ;;  %v491_v22 = vrot.slane %v490_v17, 2  ;;  %v498_v23 = vrot.slane %v497_v18, 2 }
  0x58   : > { %v485_v24 = vadd.f32 %v484_v20, %v483_v14  ;;  %v505_v25 = vrot.slane %v504_v21, 2 }
  0x59   : > { %v492_v26 = vadd.f32 %v491_v22, %v490_v17  ;;  %v499_v27 = vadd.f32 %v498_v23, %v497_v18 }
  0x5a   : > { %v486_v28 = vrot.slane %v485_v24, 1  ;;  %v506_v29 = vadd.f32 %v505_v25, %v504_v21 }
  0x5b   : > { %v493_v30 = vrot.slane %v492_v26, 1  ;;  %v500_v31 = vrot.slane %v499_v27, 1 }
  0x5c   : > { %v487_v32 = vadd.f32 %v486_v28, %v485_v24  ;;  %v507_v33 = vrot.slane %v506_v29, 1 }
  0x5d   : > { %v494_v34 = vadd.f32 %v493_v30, %v492_v26  ;;  %v501_v35 = vadd.f32 %v500_v31, %v499_v27 }
  0x5e   : > { %v508_v36 = vadd.f32 %v507_v33, %v506_v29 }
  0x5f   : > { %v513_v37 = vsel %vm466_vm11, %v494_v34, %v487_v32 }
  0x60   : > { %v514_v38 = vsel %vm468_vm12, %v501_v35, %v513_v37 }
  0x61   : > { %v515_v39 = vsel %vm470_vm13, %v508_v36, %v514_v38 }
  0x62   : > { %v517_v40 = vsel %vm473_vm14, %v515_v39, 0.0 }
  0x63   : > { %518 = vadd.xlane.f32.xlu0 %v517_v40 }
  0xdf   : > { %v476_v42 = vpop.xlane.xlu0 %475 }
  0xe0   : > { %v568_v43 = vadd.f32 %v567_v41, %v476_v42 }
  0xe2   : > { %570 = vst.msk [vmem:[%s909_s26] sm:$0xf] %vm351_vm0, %v568_v43 }
  0xe4   : > { %v566_v49 = vpop.xlane.xlu1 %565 }
  0xe5   : > { %v575_v54 = vadd.f32 %v574_v45, %v566_v49 }
  0xe7   : > { %576 = vst.msk [vmem:[%s346_s7] sm:$0xf] %vm351_vm0, %v575_v54 }
  0xf0   : > { %v519_v56 = vpop.xlane.xlu0 %518 }
  0xf1   : > { %v572_v57 = vadd.f32 %v571_v55, %v519_v56 }
  0xf3   : > { %573 = vst.msk [vmem:[%s338_s10] sm:$0xf] %vm351_vm0, %v572_v57 }
  0xf4 PF: > { %s15_s17 = sadd.s32 1, %s850_s17   ;;  %s1051_s15 = smov %s846_s16 }
  0xf5   : > { %p12_p5 = scmp.ge.s32.totalorder %s15_s17, 4   ;;  %s1052_s16 = smov %s1054_s18 }
  0xf7   :  { %14 = sbr.rel (!%p12_p5) target bundleno = 2 (0x2), region = 89 }

</bundles_post_ra>
